<compile_context>
chip_gen: v7x
topology: tpu7x:2x2x1
jax: 0.10.0
libtpu: 0.0.40
codegen_flags: <defaults>
</compile_context>

<pallas_src>
import numpy as np

import jax
import jax.numpy as jnp
from jax import lax
from jax.experimental import pallas as pl
from jax.experimental.pallas import tpu as pltpu

LN_EPS = 1e-5


def _layer_norm(x, gamma, beta):
    mu = jnp.mean(x, axis=-1, keepdims=True)
    var = jnp.mean(jnp.square(x - mu), axis=-1, keepdims=True)
    return (x - mu) * lax.rsqrt(var + LN_EPS) * gamma + beta


# ------------------------------ fused kernel --------------------------------
# grid = (B, L); one batch element per program on the parallel axis, one
# encoder layer per step on the sequential axis.  h_ref is a persistent (T, H)
# f32 VMEM scratch carrying the activation across layers.

def _layer_kernel(x_ref, emb_w_ref, emb_b_ref,
                  wqkv_ref, qkb_ref, w1_ref, b1_ref, w2_ref, vecs_ref,
                  o_ref, h_ref):
    l = pl.program_id(1)
    L = pl.num_programs(1)
    T, H = h_ref.shape
    QW = wqkv_ref.shape[2]
    nhead = (QW - 2 * H) // H            # v block is nhead*H wide (wo folded in)
    hd = H // nhead

    # ---- video embedding, only at the first layer step of this batch element ----
    @pl.when(l == 0)
    def _():
        x = x_ref[0].astype(jnp.bfloat16)                       # (T, D)
        h_ref[...] = jnp.dot(x, emb_w_ref[...],
                             preferred_element_type=jnp.float32) + emb_b_ref[...]

    h = h_ref[...]                                              # (T, H) f32

    wqkv = wqkv_ref[0]                                          # (H, 2H + nhead*H) bf16
    qkb = qkb_ref[0]                                            # (T, 2H) f32: pos folded into q/k bias
    w1 = w1_ref[0]                                              # (H, F) bf16
    b1 = b1_ref[0]                                              # (1, F) f32
    w2 = w2_ref[0]                                              # (F, H) bf16
    vecs = vecs_ref[0]                                          # (6, H) f32
    bo, b2 = vecs[0:1], vecs[1:2]
    g1, be1 = vecs[2:3], vecs[3:4]
    g2, be2 = vecs[4:5], vecs[5:6]

    # ---- fused QKV(+folded wo) projection: one lane-dense matmul ----
    qkv = jnp.dot(h.astype(jnp.bfloat16), wqkv,
                  preferred_element_type=jnp.float32)           # (T, 2H + nhead*H)
    q = (qkv[:, :H] + qkb[:, :H]).astype(jnp.bfloat16).reshape(T, nhead, hd)
    k = (qkv[:, H:2 * H] + qkb[:, H:]).astype(jnp.bfloat16).reshape(T, nhead, hd)
    v = qkv[:, 2 * H:].astype(jnp.bfloat16).reshape(T, nhead, H)  # wo already folded in

    # ---- batch-explicit multi-head attention (no mask needed) ----
    s = jnp.einsum('qhd,khd->hqk', q, k,
                   preferred_element_type=jnp.float32)          # (nhead, T, T)
    s = s - jnp.max(s, axis=-1, keepdims=True)
    p = jnp.exp(s)
    p = p * pl.reciprocal(jnp.sum(p, axis=-1, keepdims=True), approx=True)
    ctx = jnp.einsum('hqk,khd->hqd', p.astype(jnp.bfloat16), v,
                     preferred_element_type=jnp.float32)        # (nhead, T, H)
    attn = ctx.sum(axis=0) + bo                                 # (T, H)

    # ---- post-norm residual + FFN (normalize_before=False path) ----
    src = _layer_norm(h + attn, g1, be1)
    ff = jnp.maximum(
        jnp.dot(src.astype(jnp.bfloat16), w1,
                preferred_element_type=jnp.float32) + b1, 0.0)
    ff = jnp.dot(ff.astype(jnp.bfloat16), w2,
                 preferred_element_type=jnp.float32) + b2
    h_new = _layer_norm(src + ff, g2, be2)
    h_ref[...] = h_new

    # ---- epilogue: time step 0, L2-normalize, write (1, H) ----
    @pl.when(l == L - 1)
    def _():
        row = h_new[0:1, :]
        nrm = jnp.sqrt(jnp.sum(row * row, axis=-1, keepdims=True))
        o_ref[...] = (row / jnp.maximum(nrm, 1e-12))[None]


# ------------------------------- wrapper ------------------------------------

def temporal_transformer_forward(video_feats, packed):
    B, T, D = video_feats.shape
    H = packed['emb_b'].shape[1]
    L = packed['wqkv'].shape[0]
    QW = packed['wqkv'].shape[2]
    F = packed['w1'].shape[2]

    grid = (B, L)
    in_specs = [
        pl.BlockSpec((1, T, D), lambda b, l: (b, 0, 0)),          # x        (per batch elem)
        pl.BlockSpec((D, H), lambda b, l: (0, 0)),                # emb_w    bf16
        pl.BlockSpec((1, H), lambda b, l: (0, 0)),                # emb_b    f32
        pl.BlockSpec((1, H, QW), lambda b, l: (l, 0, 0)),         # wqkv     bf16 (per layer)
        pl.BlockSpec((1, T, 2 * H), lambda b, l: (l, 0, 0)),      # qk bias  f32  (pos folded)
        pl.BlockSpec((1, H, F), lambda b, l: (l, 0, 0)),          # w1       bf16
        pl.BlockSpec((1, 1, F), lambda b, l: (l, 0, 0)),          # b1       f32
        pl.BlockSpec((1, F, H), lambda b, l: (l, 0, 0)),          # w2       bf16
        pl.BlockSpec((1, 6, H), lambda b, l: (l, 0, 0)),          # bo',b2,g1,be1,g2,be2
    ]
    out_specs = pl.BlockSpec((1, 1, H), lambda b, l: (b, 0, 0))

    out = pl.pallas_call(
        _layer_kernel,
        out_shape=jax.ShapeDtypeStruct((B, 1, H), jnp.float32),
        grid_spec=pltpu.PrefetchScalarGridSpec(
            num_scalar_prefetch=0,
            grid=grid,
            in_specs=in_specs,
            out_specs=out_specs,
            scratch_shapes=[pltpu.VMEM((T, H), jnp.float32)],
        ),
        compiler_params=pltpu.CompilerParams(
            dimension_semantics=("parallel", "arbitrary"),
            vmem_limit_bytes=32 * 1024 * 1024,
        ),
    )(video_feats, packed['emb_w'], packed['emb_b'],
      packed['wqkv'], packed['qk_bias'],
      packed['w1'], packed['b1'], packed['w2'], packed['vecs'])
    return out[:, 0, :]


def pack_params(params, nhead):
    """Repack per-layer params: fuse wq|wk|(wv@wo) into one matmul, fold the
    positional embedding into a (max_len, 2H) q/k bias, fold scale into wq,
    fold bv@wo + bo into one constant bias, and store matmul weights in bf16."""
    H = params['emb_w'].shape[1]
    hd = H // nhead
    scale = 1.0 / float(np.sqrt(hd))
    pos = params['pos_table']                                   # (max_len, H)

    wqkv, qk_bias, w1, b1, w2, vecs = [], [], [], [], [], []
    for p in params['layers']:
        wq = p['wq'] * scale
        bq = p['bq'] * scale
        wk, bk = p['wk'], p['bk']

        # fold output projection into V weights, per head: wv_h @ wo_h -> (H, H)
        wv_h = p['wv'].reshape(H, nhead, hd)                    # (H, nhead, hd)
        wo_h = p['wo'].reshape(nhead, hd, H)                    # (nhead, hd, H)
        wv_fold = jnp.einsum('dhk,hkj->dhj', wv_h, wo_h).reshape(H, nhead * H)
        # softmax rows sum to 1 -> bv contribution folds into a constant bias
        bv_fold = jnp.einsum('hk,hkj->j', p['bv'].reshape(nhead, hd), wo_h)[None, :]
        bo_fold = p['bo'] + bv_fold

        wqkv.append(jnp.concatenate([wq, wk, wv_fold], axis=1))   # (H, 2H + nhead*H)
        qk_bias.append(jnp.concatenate([pos @ wq + bq, pos @ wk + bk], axis=1))  # (max_len, 2H)
        w1.append(p['w1']); b1.append(p['b1']); w2.append(p['w2'])
        vecs.append(jnp.concatenate(
            [bo_fold, p['b2'], p['g1'], p['be1'], p['g2'], p['be2']], axis=0))

    return {
        'emb_w': params['emb_w'].astype(jnp.bfloat16),
        'emb_b': params['emb_b'],
        'wqkv': jnp.stack(wqkv).astype(jnp.bfloat16),
        'qk_bias': jnp.stack(qk_bias),
        'w1': jnp.stack(w1).astype(jnp.bfloat16),
        'b1': jnp.stack(b1),
        'w2': jnp.stack(w2).astype(jnp.bfloat16),
        'vecs': jnp.stack(vecs),
    }


# -------------------------- pure-JAX reference -------------------------------

def ref_forward(x, params, nhead, normalize=True):
    def ln(v, g, b):
        mu = v.mean(-1, keepdims=True)
        var = ((v - mu) ** 2).mean(-1, keepdims=True)
        return (v - mu) / jnp.sqrt(var + LN_EPS) * g + b

    h = x @ params['emb_w'] + params['emb_b']
    T = x.shape[1]
    pos = params['pos_table'][:T][None]
    H = h.shape[-1]
    hd = H // nhead
    scale = 1.0 / np.sqrt(hd)
    for p in params['layers']:
        qk = h + pos
        q = qk @ p['wq'] + p['bq']
        k = qk @ p['wk'] + p['bk']
        v = h @ p['wv'] + p['bv']

        def split(a):
            B_, T_, _ = a.shape
            return a.reshape(B_, T_, nhead, hd).transpose(0, 2, 1, 3)

        qh, kh, vh = split(q), split(k), split(v)
        s = jnp.einsum('bhqd,bhkd->bhqk', qh * scale, kh)
        a = jax.nn.softmax(s, axis=-1)
        o = jnp.einsum('bhqk,bhkd->bhqd', a, vh).transpose(0, 2, 1, 3).reshape(h.shape)
        o = o @ p['wo'] + p['bo']
        src = ln(h + o, p['g1'], p['be1'])
        ff = jax.nn.relu(src @ p['w1'] + p['b1']) @ p['w2'] + p['b2']
        h = ln(src + ff, p['g2'], p['be2'])
    if normalize:
        h = h / jnp.maximum(jnp.linalg.norm(h, axis=-1, keepdims=True), 1e-12)
    return h[:, 0, :]


# ------------------------------ parameters -----------------------------------

def init_params(key, D, H, Fdim, n_layers, max_len):
    ks = jax.random.split(key, 3 + n_layers)
    s = 0.05
    params = {
        'emb_w': jax.random.normal(ks[0], (D, H), jnp.float32) * s,
        'emb_b': jax.random.normal(ks[1], (1, H), jnp.float32) * s,
        'pos_table': jax.random.normal(ks[2], (max_len, H), jnp.float32) * s,
        'layers': [],
    }
    for i in range(n_layers):
        lk = jax.random.split(ks[3 + i], 12)
        layer = {
            'wq': jax.random.normal(lk[0], (H, H), jnp.float32) * s,
            'bq': jax.random.normal(lk[1], (1, H), jnp.float32) * s,
            'wk': jax.random.normal(lk[2], (H, H), jnp.float32) * s,
            'bk': jax.random.normal(lk[3], (1, H), jnp.float32) * s,
            'wv': jax.random.normal(lk[4], (H, H), jnp.float32) * s,
            'bv': jax.random.normal(lk[5], (1, H), jnp.float32) * s,
            'wo': jax.random.normal(lk[6], (H, H), jnp.float32) * s,
            'bo': jax.random.normal(lk[7], (1, H), jnp.float32) * s,
            'w1': jax.random.normal(lk[8], (H, Fdim), jnp.float32) * s,
            'b1': jax.random.normal(lk[9], (1, Fdim), jnp.float32) * s,
            'w2': jax.random.normal(lk[10], (Fdim, H), jnp.float32) * s,
            'b2': jax.random.normal(lk[11], (1, H), jnp.float32) * s,
            'g1': jnp.ones((1, H), jnp.float32),
            'be1': jnp.zeros((1, H), jnp.float32),
            'g2': jnp.ones((1, H), jnp.float32),
            'be2': jnp.zeros((1, H), jnp.float32),
        }
        params['layers'].append(layer)
    return params


# --------------------------------- main --------------------------------------

if __name__ == "__main__":
    B, T, D = 2, 8, 48          # batch, frames, expert feature dim
    H, NHEAD, NLAYERS, FFN = 32, 4, 2, 64
    MAX_LEN = 64

    key = jax.random.PRNGKey(0)
    kx, kp = jax.random.split(key)
    video_feats = jax.random.normal(kx, (B, T, D), jnp.float32)
    params = init_params(kp, D, H, FFN, NLAYERS, MAX_LEN)
    packed = pack_params(params, NHEAD)

    out = temporal_transformer_forward(video_feats, packed)
    out = jax.block_until_ready(out)
    assert out.shape == (B, H), out.shape

    ref = ref_forward(video_feats, params, NHEAD, normalize=True)
    err = float(jnp.max(jnp.abs(out - ref)))
    assert err < 5e-2, f"max abs error {err}"

    print("KERNEL_OK")
</pallas_src>

<mosaic_0001>
module attributes {stable_mosaic.version = 11 : i64} {
  func.func @_layer_kernel(%arg0: i32, %arg1: i32, %arg2: memref<1x8x48xf32, #tpu.memory_space<vmem>>, %arg3: memref<48x32xbf16, #tpu.memory_space<vmem>>, %arg4: memref<1x32xf32, #tpu.memory_space<vmem>>, %arg5: memref<1x32x192xbf16, #tpu.memory_space<vmem>>, %arg6: memref<1x8x64xf32, #tpu.memory_space<vmem>>, %arg7: memref<1x32x64xbf16, #tpu.memory_space<vmem>>, %arg8: memref<1x1x64xf32, #tpu.memory_space<vmem>>, %arg9: memref<1x64x32xbf16, #tpu.memory_space<vmem>>, %arg10: memref<1x6x32xf32, #tpu.memory_space<vmem>>, %arg11: memref<1x1x32xf32, #tpu.memory_space<vmem>>, %arg12: memref<8x32xf32, #tpu.memory_space<vmem>>) attributes {dimension_semantics = [#tpu.dimension_semantics<parallel>, #tpu.dimension_semantics<arbitrary>], iteration_bounds = array<i64: 2, 2>, scalar_prefetch = 0 : i64, scratch_operands = 1 : i64, tpu.core_type = #tpu.core_type<tc>, window_params = [{transform_indices = @transform_0, window_bounds = array<i64: 1, 8, 48>}, {pipeline_mode = #tpu.pipeline_mode<synchronous>, transform_indices = @transform_1, window_bounds = array<i64: 48, 32>}, {pipeline_mode = #tpu.pipeline_mode<synchronous>, transform_indices = @transform_2, window_bounds = array<i64: 1, 32>}, {transform_indices = @transform_3, window_bounds = array<i64: 1, 32, 192>}, {transform_indices = @transform_4, window_bounds = array<i64: 1, 8, 64>}, {transform_indices = @transform_5, window_bounds = array<i64: 1, 32, 64>}, {transform_indices = @transform_6, window_bounds = array<i64: 1, 1, 64>}, {transform_indices = @transform_7, window_bounds = array<i64: 1, 64, 32>}, {transform_indices = @transform_8, window_bounds = array<i64: 1, 6, 32>}, {transform_indices = @transform_9, window_bounds = array<i64: 1, 1, 32>}]} {
    %c0_i32 = arith.constant 0 : i32
    %0 = arith.cmpi eq, %arg1, %c0_i32 : i32
    %1 = arith.extui %0 : i1 to i32
    %c0_i32_0 = arith.constant 0 : i32
    %2 = arith.cmpi ne, %1, %c0_i32_0 : i32
    scf.if %2 {
      %c0_41 = arith.constant 0 : index
      %c0_42 = arith.constant 0 : index
      %c0_43 = arith.constant 0 : index
      %113 = vector.load %arg2[%c0_41, %c0_42, %c0_43] : memref<1x8x48xf32, #tpu.memory_space<vmem>>, vector<1x8x48xf32>
      %114 = vector.shape_cast %113 : vector<1x8x48xf32> to vector<8x48xf32>
      %115 = arith.truncf %114 : vector<8x48xf32> to vector<8x48xbf16>
      %c0_44 = arith.constant 0 : index
      %c0_45 = arith.constant 0 : index
      %116 = vector.load %arg3[%c0_44, %c0_45] : memref<48x32xbf16, #tpu.memory_space<vmem>>, vector<48x32xbf16>
      %cst_46 = arith.constant dense<0.000000e+00> : vector<8x32xf32>
      %117 = tpu.matmul %115, %116, %cst_46 {dimension_numbers = #tpu.dot_dimension_numbers<[1], [0], [0], [1], [0, 0, 1, 1], [], []>} : vector<8x48xbf16>, vector<48x32xbf16>, vector<8x32xf32> -> vector<8x32xf32>
      %c0_47 = arith.constant 0 : index
      %c0_48 = arith.constant 0 : index
      %118 = vector.load %arg4[%c0_47, %c0_48] : memref<1x32xf32, #tpu.memory_space<vmem>>, vector<1x32xf32>
      %119 = vector.broadcast %118 : vector<1x32xf32> to vector<8x32xf32>
      %120 = arith.addf %117, %119 : vector<8x32xf32>
      %c0_49 = arith.constant 0 : index
      %c0_50 = arith.constant 0 : index
      %121 = vector.load %arg12[%c0_49, %c0_50] : memref<8x32xf32, #tpu.memory_space<vmem>>, vector<8x32xf32>
      tpu.vector_store %arg12[%c0_49, %c0_50], %120 {strides = array<i32>} : memref<8x32xf32, #tpu.memory_space<vmem>>, vector<8x32xf32>,
    } else {
    }
    %c0 = arith.constant 0 : index
    %c0_1 = arith.constant 0 : index
    %3 = vector.load %arg12[%c0, %c0_1] : memref<8x32xf32, #tpu.memory_space<vmem>>, vector<8x32xf32>
    %c0_2 = arith.constant 0 : index
    %c0_3 = arith.constant 0 : index
    %c0_4 = arith.constant 0 : index
    %4 = vector.load %arg5[%c0_2, %c0_3, %c0_4] : memref<1x32x192xbf16, #tpu.memory_space<vmem>>, vector<1x32x192xbf16>
    %5 = vector.shape_cast %4 : vector<1x32x192xbf16> to vector<32x192xbf16>
    %c0_5 = arith.constant 0 : index
    %c0_6 = arith.constant 0 : index
    %c0_7 = arith.constant 0 : index
    %6 = vector.load %arg6[%c0_5, %c0_6, %c0_7] : memref<1x8x64xf32, #tpu.memory_space<vmem>>, vector<1x8x64xf32>
    %7 = vector.shape_cast %6 : vector<1x8x64xf32> to vector<8x64xf32>
    %c0_8 = arith.constant 0 : index
    %c0_9 = arith.constant 0 : index
    %c0_10 = arith.constant 0 : index
    %8 = vector.load %arg7[%c0_8, %c0_9, %c0_10] : memref<1x32x64xbf16, #tpu.memory_space<vmem>>, vector<1x32x64xbf16>
    %9 = vector.shape_cast %8 : vector<1x32x64xbf16> to vector<32x64xbf16>
    %c0_11 = arith.constant 0 : index
    %c0_12 = arith.constant 0 : index
    %c0_13 = arith.constant 0 : index
    %10 = vector.load %arg8[%c0_11, %c0_12, %c0_13] : memref<1x1x64xf32, #tpu.memory_space<vmem>>, vector<1x1x64xf32>
    %11 = vector.shape_cast %10 : vector<1x1x64xf32> to vector<1x64xf32>
    %c0_14 = arith.constant 0 : index
    %c0_15 = arith.constant 0 : index
    %c0_16 = arith.constant 0 : index
    %12 = vector.load %arg9[%c0_14, %c0_15, %c0_16] : memref<1x64x32xbf16, #tpu.memory_space<vmem>>, vector<1x64x32xbf16>
    %13 = vector.shape_cast %12 : vector<1x64x32xbf16> to vector<64x32xbf16>
    %c0_17 = arith.constant 0 : index
    %c0_18 = arith.constant 0 : index
    %c0_19 = arith.constant 0 : index
    %14 = vector.load %arg10[%c0_17, %c0_18, %c0_19] : memref<1x6x32xf32, #tpu.memory_space<vmem>>, vector<1x6x32xf32>
    %15 = vector.shape_cast %14 : vector<1x6x32xf32> to vector<6x32xf32>
    %16 = vector.extract_strided_slice %15 {offsets = [0, 0], sizes = [1, 32], strides = [1, 1]} : vector<6x32xf32> to vector<1x32xf32>
    %17 = vector.extract_strided_slice %15 {offsets = [1, 0], sizes = [1, 32], strides = [1, 1]} : vector<6x32xf32> to vector<1x32xf32>
    %18 = vector.extract_strided_slice %15 {offsets = [2, 0], sizes = [1, 32], strides = [1, 1]} : vector<6x32xf32> to vector<1x32xf32>
    %19 = vector.extract_strided_slice %15 {offsets = [3, 0], sizes = [1, 32], strides = [1, 1]} : vector<6x32xf32> to vector<1x32xf32>
    %20 = vector.extract_strided_slice %15 {offsets = [4, 0], sizes = [1, 32], strides = [1, 1]} : vector<6x32xf32> to vector<1x32xf32>
    %21 = vector.extract_strided_slice %15 {offsets = [5, 0], sizes = [1, 32], strides = [1, 1]} : vector<6x32xf32> to vector<1x32xf32>
    %22 = arith.truncf %3 : vector<8x32xf32> to vector<8x32xbf16>
    %cst = arith.constant dense<0.000000e+00> : vector<8x192xf32>
    %23 = tpu.matmul %22, %5, %cst {dimension_numbers = #tpu.dot_dimension_numbers<[1], [0], [0], [1], [0, 0, 1, 1], [], []>} : vector<8x32xbf16>, vector<32x192xbf16>, vector<8x192xf32> -> vector<8x192xf32>
    %24 = vector.extract_strided_slice %23 {offsets = [0, 0], sizes = [8, 32], strides = [1, 1]} : vector<8x192xf32> to vector<8x32xf32>
    %25 = vector.extract_strided_slice %7 {offsets = [0, 0], sizes = [8, 32], strides = [1, 1]} : vector<8x64xf32> to vector<8x32xf32>
    %26 = arith.addf %24, %25 : vector<8x32xf32>
    %27 = arith.truncf %26 : vector<8x32xf32> to vector<8x32xbf16>
    %28 = vector.shape_cast %27 : vector<8x32xbf16> to vector<8x4x8xbf16>
    %29 = vector.extract_strided_slice %23 {offsets = [0, 32], sizes = [8, 32], strides = [1, 1]} : vector<8x192xf32> to vector<8x32xf32>
    %30 = vector.extract_strided_slice %7 {offsets = [0, 32], sizes = [8, 32], strides = [1, 1]} : vector<8x64xf32> to vector<8x32xf32>
    %31 = arith.addf %29, %30 : vector<8x32xf32>
    %32 = arith.truncf %31 : vector<8x32xf32> to vector<8x32xbf16>
    %33 = vector.shape_cast %32 : vector<8x32xbf16> to vector<8x4x8xbf16>
    %34 = vector.extract_strided_slice %23 {offsets = [0, 64], sizes = [8, 128], strides = [1, 1]} : vector<8x192xf32> to vector<8x128xf32>
    %35 = arith.truncf %34 : vector<8x128xf32> to vector<8x128xbf16>
    %36 = vector.shape_cast %35 : vector<8x128xbf16> to vector<8x4x32xbf16>
    "tpu.trace_start"() <{level = 10 : i32, message = "qhd,khd->hqk"}> : () -> ()
    %cst_20 = arith.constant dense<0.000000e+00> : vector<4x8x8xf32>
    %37 = tpu.matmul %28, %33, %cst_20 {dimension_numbers = #tpu.dot_dimension_numbers<[2], [2], [0], [0], [0, 1, 0, 0, 1, 0], [1], [1]>} : vector<8x4x8xbf16>, vector<8x4x8xbf16>, vector<4x8x8xf32> -> vector<4x8x8xf32>
    "tpu.trace_stop"() : () -> ()
    %cst_21 = arith.constant dense<0xFF800000> : vector<4x8xf32>
    %38 = vector.multi_reduction <maximumf>, %37, %cst_21 [2] : vector<4x8x8xf32> to vector<4x8xf32>
    %39 = vector.shape_cast %38 : vector<4x8xf32> to vector<4x8x1xf32>
    %40 = vector.broadcast %39 : vector<4x8x1xf32> to vector<4x8x8xf32>
    %41 = arith.subf %37, %40 : vector<4x8x8xf32>
    %42 = math.exp %41 : vector<4x8x8xf32>
    %cst_22 = arith.constant dense<0.000000e+00> : vector<4x8xf32>
    %43 = vector.multi_reduction <add>, %42, %cst_22 [2] : vector<4x8x8xf32> to vector<4x8xf32>
    %44 = vector.shape_cast %43 : vector<4x8xf32> to vector<4x8x1xf32>
    %45 = tpu.reciprocal %44 {approx = true} : vector<4x8x1xf32> -> vector<4x8x1xf32>
    %46 = vector.broadcast %45 : vector<4x8x1xf32> to vector<4x8x8xf32>
    %47 = arith.mulf %42, %46 : vector<4x8x8xf32>
    %48 = arith.truncf %47 : vector<4x8x8xf32> to vector<4x8x8xbf16>
    "tpu.trace_start"() <{level = 10 : i32, message = "hqk,khd->hqd"}> : () -> ()
    %cst_23 = arith.constant dense<0.000000e+00> : vector<4x8x32xf32>
    %49 = tpu.matmul %48, %36, %cst_23 {dimension_numbers = #tpu.dot_dimension_numbers<[2], [0], [1], [2], [0, 0, 0, 1, 1, 2], [0], [1]>} : vector<4x8x8xbf16>, vector<8x4x32xbf16>, vector<4x8x32xf32> -> vector<4x8x32xf32>
    "tpu.trace_stop"() : () -> ()
    %cst_24 = arith.constant dense<0.000000e+00> : vector<8x32xf32>
    %50 = vector.multi_reduction <add>, %49, %cst_24 [0] : vector<4x8x32xf32> to vector<8x32xf32>
    %51 = vector.broadcast %16 : vector<1x32xf32> to vector<8x32xf32>
    %52 = arith.addf %50, %51 : vector<8x32xf32>
    %53 = arith.addf %3, %52 : vector<8x32xf32>
    %cst_25 = arith.constant dense<0.000000e+00> : vector<8xf32>
    %54 = vector.multi_reduction <add>, %53, %cst_25 [1] : vector<8x32xf32> to vector<8xf32>
    %55 = vector.shape_cast %54 : vector<8xf32> to vector<8x1xf32>
    %cst_26 = arith.constant 3.200000e+01 : f32
    %56 = vector.broadcast %cst_26 : f32 to vector<8x1xf32>
    %57 = arith.divf %55, %56 : vector<8x1xf32>
    %58 = vector.broadcast %57 : vector<8x1xf32> to vector<8x32xf32>
    %59 = arith.subf %53, %58 : vector<8x32xf32>
    %60 = arith.mulf %59, %59 : vector<8x32xf32>
    %cst_27 = arith.constant dense<0.000000e+00> : vector<8xf32>
    %61 = vector.multi_reduction <add>, %60, %cst_27 [1] : vector<8x32xf32> to vector<8xf32>
    %62 = vector.shape_cast %61 : vector<8xf32> to vector<8x1xf32>
    %cst_28 = arith.constant 3.200000e+01 : f32
    %63 = vector.broadcast %cst_28 : f32 to vector<8x1xf32>
    %64 = arith.divf %62, %63 : vector<8x1xf32>
    %65 = vector.broadcast %57 : vector<8x1xf32> to vector<8x32xf32>
    %66 = arith.subf %53, %65 : vector<8x32xf32>
    %cst_29 = arith.constant 9.99999974E-6 : f32
    %67 = vector.broadcast %cst_29 : f32 to vector<8x1xf32>
    %68 = arith.addf %64, %67 : vector<8x1xf32>
    %69 = math.rsqrt %68 : vector<8x1xf32>
    %70 = vector.broadcast %69 : vector<8x1xf32> to vector<8x32xf32>
    %71 = arith.mulf %66, %70 : vector<8x32xf32>
    %72 = vector.broadcast %18 : vector<1x32xf32> to vector<8x32xf32>
    %73 = arith.mulf %71, %72 : vector<8x32xf32>
    %74 = vector.broadcast %19 : vector<1x32xf32> to vector<8x32xf32>
    %75 = arith.addf %73, %74 : vector<8x32xf32>
    %76 = arith.truncf %75 : vector<8x32xf32> to vector<8x32xbf16>
    %cst_30 = arith.constant dense<0.000000e+00> : vector<8x64xf32>
    %77 = tpu.matmul %76, %9, %cst_30 {dimension_numbers = #tpu.dot_dimension_numbers<[1], [0], [0], [1], [0, 0, 1, 1], [], []>} : vector<8x32xbf16>, vector<32x64xbf16>, vector<8x64xf32> -> vector<8x64xf32>
    %78 = vector.broadcast %11 : vector<1x64xf32> to vector<8x64xf32>
    %79 = arith.addf %77, %78 : vector<8x64xf32>
    %cst_31 = arith.constant 0.000000e+00 : f32
    %80 = vector.broadcast %cst_31 : f32 to vector<8x64xf32>
    %81 = arith.maximumf %79, %80 : vector<8x64xf32>
    %82 = arith.truncf %81 : vector<8x64xf32> to vector<8x64xbf16>
    %cst_32 = arith.constant dense<0.000000e+00> : vector<8x32xf32>
    %83 = tpu.matmul %82, %13, %cst_32 {dimension_numbers = #tpu.dot_dimension_numbers<[1], [0], [0], [1], [0, 0, 1, 1], [], []>} : vector<8x64xbf16>, vector<64x32xbf16>, vector<8x32xf32> -> vector<8x32xf32>
    %84 = vector.broadcast %17 : vector<1x32xf32> to vector<8x32xf32>
    %85 = arith.addf %83, %84 : vector<8x32xf32>
    %86 = arith.addf %75, %85 : vector<8x32xf32>
    %cst_33 = arith.constant dense<0.000000e+00> : vector<8xf32>
    %87 = vector.multi_reduction <add>, %86, %cst_33 [1] : vector<8x32xf32> to vector<8xf32>
    %88 = vector.shape_cast %87 : vector<8xf32> to vector<8x1xf32>
    %cst_34 = arith.constant 3.200000e+01 : f32
    %89 = vector.broadcast %cst_34 : f32 to vector<8x1xf32>
    %90 = arith.divf %88, %89 : vector<8x1xf32>
    %91 = vector.broadcast %90 : vector<8x1xf32> to vector<8x32xf32>
    %92 = arith.subf %86, %91 : vector<8x32xf32>
    %93 = arith.mulf %92, %92 : vector<8x32xf32>
    %cst_35 = arith.constant dense<0.000000e+00> : vector<8xf32>
    %94 = vector.multi_reduction <add>, %93, %cst_35 [1] : vector<8x32xf32> to vector<8xf32>
    %95 = vector.shape_cast %94 : vector<8xf32> to vector<8x1xf32>
    %cst_36 = arith.constant 3.200000e+01 : f32
    %96 = vector.broadcast %cst_36 : f32 to vector<8x1xf32>
    %97 = arith.divf %95, %96 : vector<8x1xf32>
    %98 = vector.broadcast %90 : vector<8x1xf32> to vector<8x32xf32>
    %99 = arith.subf %86, %98 : vector<8x32xf32>
    %cst_37 = arith.constant 9.99999974E-6 : f32
    %100 = vector.broadcast %cst_37 : f32 to vector<8x1xf32>
    %101 = arith.addf %97, %100 : vector<8x1xf32>
    %102 = math.rsqrt %101 : vector<8x1xf32>
    %103 = vector.broadcast %102 : vector<8x1xf32> to vector<8x32xf32>
    %104 = arith.mulf %99, %103 : vector<8x32xf32>
    %105 = vector.broadcast %20 : vector<1x32xf32> to vector<8x32xf32>
    %106 = arith.mulf %104, %105 : vector<8x32xf32>
    %107 = vector.broadcast %21 : vector<1x32xf32> to vector<8x32xf32>
    %108 = arith.addf %106, %107 : vector<8x32xf32>
    %c0_38 = arith.constant 0 : index
    %c0_39 = arith.constant 0 : index
    %109 = vector.load %arg12[%c0_38, %c0_39] : memref<8x32xf32, #tpu.memory_space<vmem>>, vector<8x32xf32>
    tpu.vector_store %arg12[%c0_38, %c0_39], %108 {strides = array<i32>} : memref<8x32xf32, #tpu.memory_space<vmem>>, vector<8x32xf32>,
    %c1_i32 = arith.constant 1 : i32
    %110 = arith.cmpi eq, %arg1, %c1_i32 : i32
    %111 = arith.extui %110 : i1 to i32
    %c0_i32_40 = arith.constant 0 : i32
    %112 = arith.cmpi ne, %111, %c0_i32_40 : i32
    scf.if %112 {
      %113 = vector.extract_strided_slice %108 {offsets = [0, 0], sizes = [1, 32], strides = [1, 1]} : vector<8x32xf32> to vector<1x32xf32>
      %114 = arith.mulf %113, %113 : vector<1x32xf32>
      %cst_41 = arith.constant dense<0.000000e+00> : vector<1xf32>
      %115 = vector.multi_reduction <add>, %114, %cst_41 [1] : vector<1x32xf32> to vector<1xf32>
      %116 = vector.shape_cast %115 : vector<1xf32> to vector<1x1xf32>
      %117 = math.sqrt %116 : vector<1x1xf32>
      %cst_42 = arith.constant 9.99999996E-13 : f32
      %118 = vector.broadcast %cst_42 : f32 to vector<1x1xf32>
      %119 = arith.maximumf %117, %118 : vector<1x1xf32>
      %120 = vector.broadcast %119 : vector<1x1xf32> to vector<1x32xf32>
      %121 = arith.divf %113, %120 : vector<1x32xf32>
      %122 = vector.shape_cast %121 : vector<1x32xf32> to vector<1x1x32xf32>
      %c0_43 = arith.constant 0 : index
      %c0_44 = arith.constant 0 : index
      %c0_45 = arith.constant 0 : index
      %123 = vector.load %arg11[%c0_43, %c0_44, %c0_45] : memref<1x1x32xf32, #tpu.memory_space<vmem>>, vector<1x1x32xf32>
      tpu.vector_store %arg11[%c0_43, %c0_44, %c0_45], %122 {strides = array<i32>} : memref<1x1x32xf32, #tpu.memory_space<vmem>>, vector<1x1x32xf32>,
    } else {
    }
    return
  }
  func.func @transform_0(%arg0: i32, %arg1: i32) -> (i32, i32, i32) {
    %c0_i32 = arith.constant 0 : i32
    %c0_i32_0 = arith.constant 0 : i32
    %c0_i32_1 = arith.constant 0 : i32
    return %arg0, %c0_i32, %c0_i32_0 : i32, i32, i32
  }
  func.func @transform_1(%arg0: i32, %arg1: i32) -> (i32, i32) {
    %c0_i32 = arith.constant 0 : i32
    %c0_i32_0 = arith.constant 0 : i32
    %c0_i32_1 = arith.constant 0 : i32
    return %c0_i32, %c0_i32_0 : i32, i32
  }
  func.func @transform_2(%arg0: i32, %arg1: i32) -> (i32, i32) {
    %c0_i32 = arith.constant 0 : i32
    %c0_i32_0 = arith.constant 0 : i32
    %c0_i32_1 = arith.constant 0 : i32
    return %c0_i32, %c0_i32_0 : i32, i32
  }
  func.func @transform_3(%arg0: i32, %arg1: i32) -> (i32, i32, i32) {
    %c0_i32 = arith.constant 0 : i32
    %c0_i32_0 = arith.constant 0 : i32
    %c0_i32_1 = arith.constant 0 : i32
    return %arg1, %c0_i32, %c0_i32_0 : i32, i32, i32
  }
  func.func @transform_4(%arg0: i32, %arg1: i32) -> (i32, i32, i32) {
    %c0_i32 = arith.constant 0 : i32
    %c0_i32_0 = arith.constant 0 : i32
    %c0_i32_1 = arith.constant 0 : i32
    return %arg1, %c0_i32, %c0_i32_0 : i32, i32, i32
  }
  func.func @transform_5(%arg0: i32, %arg1: i32) -> (i32, i32, i32) {
    %c0_i32 = arith.constant 0 : i32
    %c0_i32_0 = arith.constant 0 : i32
    %c0_i32_1 = arith.constant 0 : i32
    return %arg1, %c0_i32, %c0_i32_0 : i32, i32, i32
  }
  func.func @transform_6(%arg0: i32, %arg1: i32) -> (i32, i32, i32) {
    %c0_i32 = arith.constant 0 : i32
    %c0_i32_0 = arith.constant 0 : i32
    %c0_i32_1 = arith.constant 0 : i32
    return %arg1, %c0_i32, %c0_i32_0 : i32, i32, i32
  }
  func.func @transform_7(%arg0: i32, %arg1: i32) -> (i32, i32, i32) {
    %c0_i32 = arith.constant 0 : i32
    %c0_i32_0 = arith.constant 0 : i32
    %c0_i32_1 = arith.constant 0 : i32
    return %arg1, %c0_i32, %c0_i32_0 : i32, i32, i32
  }
  func.func @transform_8(%arg0: i32, %arg1: i32) -> (i32, i32, i32) {
    %c0_i32 = arith.constant 0 : i32
    %c0_i32_0 = arith.constant 0 : i32
    %c0_i32_1 = arith.constant 0 : i32
    return %arg1, %c0_i32, %c0_i32_0 : i32, i32, i32
  }
  func.func @transform_9(%arg0: i32, %arg1: i32) -> (i32, i32, i32) {
    %c0_i32 = arith.constant 0 : i32
    %c0_i32_0 = arith.constant 0 : i32
    %c0_i32_1 = arith.constant 0 : i32
    return %arg0, %c0_i32, %c0_i32_0 : i32, i32, i32
  }
}

</mosaic_0001>

<bundles_post_ra>
// kernel: tpu_custom_call.1
= control target key start
LH: loop header
LB: loop body
LE: loop exit
PB: predicated region body
PF: predicated region fallthrough
CT: control target
= control target key end

     0   :  { %s2697_s0 = inlined_call_operand.vmem [shape: f32[2,8,48], index: 0, kind: input, shape index: {}]   ;;  %s2698_s1 = inlined_call_operand.vmem [shape: bf16[48,32], index: 1, kind: input, shape index: {}]   ;;  %s2699_s2 = inlined_call_operand.hbm [shape: f32[1,32], index: 2, kind: input, shape index: {}]   ;;  %s2700_s3 = inlined_call_operand.hbm [shape: bf16[2,32,192], index: 3, kind: input, shape index: {}]   ;;  %s2701_s4 = inlined_call_operand.vmem [shape: f32[2,64,64], index: 4, kind: input, shape index: {}]   ;;  %s2702_s5 = inlined_call_operand.hbm [shape: bf16[2,32,64], index: 5, kind: input, shape index: {}]   ;;  %s2703_s6 = inlined_call_operand.vmem [shape: f32[2,1,64], index: 6, kind: input, shape index: {}]   ;;  %s2704_s7 = inlined_call_operand.vmem [shape: bf16[2,64,32], index: 7, kind: input, shape index: {}]   ;;  %s2705_s8 = inlined_call_operand.vmem [shape: f32[2,6,32], index: 8, kind: input, shape index: {}]   ;;  %s2706_s9 = inlined_call_operand.hbm [shape: f32[2,1,32], index: 9, kind: output, shape index: {}]  }
   0x1   :  { %2720 = sst [smem:[#allocation22_spill]] %s2697_s0 }
   0x2   :  { %2721 = sst [smem:[#allocation23_spill]] %s2698_s1 }
   0x3   :  { %2722 = sst [smem:[#allocation24_spill]] %s2699_s2 }
   0x4   :  { %2723 = sst [smem:[#allocation25_spill]] %s2700_s3 }
   0x5   :  { %2724 = sst [smem:[#allocation26_spill]] %s2702_s5 }
   0x6   :  { %2725 = sst [smem:[#allocation27_spill]] %s2704_s7 }
   0x7   :  { %2726 = sst [smem:[#allocation28_spill]] %s2705_s8 }
   0x8   :  { %2727 = sst [smem:[#allocation29_spill]] %s2706_s9 }
   0x9   :  { %14 = vsyncpa [#allocation4], 0 }
   0xa   :  { %15 = vsyncpa [#allocation7], 0 }
   0xb   :  { %17 = vsyncpa [#allocation7 + $0x1], 0 }
   0xc   :  { %18 = vsyncpa [#allocation5], 0 }
   0xd   :  { %20 = vsyncpa [#allocation5 + $0x1], 0  ;;  %s2208_s30 = smov 0   ;;  %s2210_s10 = smov 0  }
   0xe   :  { %s2212_s11 = smov 0   ;;  %s2214_s12 = smov 0  }
   0xf   :  { %s2216_s13 = smov 0   ;;  %s2218_s14 = smov 0  }
  0x10   :  { %s2220_s15 = smov 0   ;;  %s2222_s16 = smov 0  }
  0x11   :  { %s2224_s17 = smov 0   ;;  %s2226_s18 = smov 0  }
  0x12   :  { %s2228_s19 = smov 0  }
  0x13 LB: > { %2728 = sst [smem:[#allocation13_spill]] %s2105_s11  ;;  %s35_s20 = sadd.s32 1, %s2129_s17  ;;  %s2137_s19 = sphi %s2228_s19, %s26_s19   ;;  %s2133_s18 = sphi %s2226_s18, %s2768_s18   ;;  %s2129_s17 = sphi %s2224_s17, %s2767_s17   ;;  %s2125_s16 = sphi %s2222_s16, %s2766_s16   ;;  %s2121_s15 = sphi %s2220_s15, %s2765_s15   ;;  %s2117_s14 = sphi %s2218_s14, %s2764_s14   ;;  %s2113_s13 = sphi %s2216_s13, %s2763_s13   ;;  %s2109_s12 = sphi %s2214_s12, %s2762_s12   ;;  %s2105_s11 = sphi %s2212_s11, %s2761_s11   ;;  %s2101_s10 = sphi %s2210_s10, %s2770_s10   ;;  %s2097_s30 = sphi %s2208_s30, %s2769_s30  }
  0x14   : > { %2729 = sst [smem:[#allocation14_spill]] %s2113_s13  ;;  %s38_s21 = sadd.s32 1, %s2133_s18 }
  0x15   : > { %2730 = sst [smem:[#allocation15_spill]] %s2117_s14  ;;  %p36_p0 = scmp.ge.s32.totalorder %s35_s20, 2 }
  0x16   : > { %2731 = sst [smem:[#allocation16_spill]] %s2129_s17  ;;  %s113_s22 = sadd.s32 1, %s2117_s14 }
  0x17   : > { %2732 = sst [smem:[#allocation17_spill]] %s2133_s18  ;;  %p120_p1 = scmp.ne.s32.totalorder %s2117_s14, %s2113_s13 }
  0x18   : > { %p121_p2 = scmp.eq.s32.totalorder %s2137_s19, 0  ;;  %s2772_s20 = smov (%p36_p0, %s35_s20), 0 }
  0x19   : > { %2733 = sst [smem:[#allocation18_spill]] %s2772_s20  ;;  %s2774_s21 = smov (!%p36_p0, %s38_s21), %s2133_s18 }
  0x1a   : > { %s110_s23 = ssub.s32 %s2129_s17, %s2772_s20  ;;  %p2276_p3 = por %p121_p2, %p120_p1 }
  0x1b   : > { %p40_p4 = scmp.ge.s32.totalorder %s2774_s21, 2  ;;  %p111_p5 = scmp.eq.s32.totalorder %s110_s23, 0 }
  0x1c   : > { %p1777_p6 = scmp.lt.s32.totalorder %s2137_s19, 4  ;;  %s327_s26 = sand.u32 1, %s2137_s19  }
  0x1d   : > { %s2283_s25 = scalar_select %p111_p5, %s2117_s14, %s113_s22  }
  0x1e   : > { %s329_s27 = sand.u32 1, %s2117_s14   ;;  %s1641_s29 = sshll.u32 %s2129_s17, 9 }
  0x1f   : > { %2735 = sst [smem:[#allocation19_spill]] %s2283_s25  ;;  %s1593_s28 = sshll.u32 %s329_s27, 5 }
  0x20   : > { %s2736_s3 = sld [smem:[#allocation25_spill]]  ;;  %s331_s20 = scalar_lea.vmem [#allocation6], %s1593_s28 }
  0x21   : > { %s338_s7 = sshll.u32 %s331_s20, 4  ;;  %p2297_p7 = pnand %p1777_p6, %p2276_p3  ;;  %s2293_s7 = int_to_ptr.vmem [resolvable:$true] %s338_s7 }
  0x22   : > { %s2301_s23 = sshll.u32 %s329_s27, 4  ;;  %s2303_s1 = scalar_lea.sflag [#allocation7], %s327_s26 }
  0x23   : > { %p1925_p9 = pneg %p2297_p7 }
  0x26   : > { %s2291_s8 = scalar_lea.hbm %s2736_s3, %s1641_s29  ;;  %s1928_s28 = scalar_lea.hbm %s2736_s3, 1024 }
  0x27   : > { %s1923_s9 = scalar_lea.hbm %s2291_s8, 512  ;;  %p1929_p12 = scmp.lt.u32.totalorder %s2291_s8, %s2736_s3 }
  0x28   : > { %p1924_p8 = scmp.ne.s32.totalorder %s2291_s8, %s1923_s9  ;;  %p1930_p13 = scmp.lt.u32.totalorder %s1928_s28, %s1923_s9 }
  0x29   : > { %p1932_p1 = scmp.lt.u32.totalorder %s1923_s9, %s2291_s8 }
  0x2a   : > { %p1926_p10 = pnand %p1925_p9, %p1924_p8  ;;  %p1931_p0 = por %p1930_p13, %p1929_p12 }
  0x2c   : > { %p1927_p11 = pneg %p1926_p10  ;;  %p1933_p2 = por %p1932_p1, %p1931_p0 }
  0x2e   : > { %p1934_p3 = pnand %p1933_p2, %p1927_p11 }
  0x30   : > { %1937 = shalt.err (!%p1934_p3)
}
  0x31   : > { %s1938_s26 = scalar_lea.vmem %s2293_s7, 512  ;;  %s2139_s27 = smov [#allocation6]  }
  0x32   : > { %p1939_p5 = scmp.ne.s32.totalorder %s2293_s7, %s1938_s26  ;;  %s1943_s20 = sshll.u32 %s2139_s27, 4  ;;  %s1944_s20 = int_to_ptr.vmem [resolvable:$false] %s1943_s20 }
  0x33   : > { %s1945_s25 = scalar_lea.vmem %s1944_s20, 1024  ;;  %p1946_p10 = scmp.lt.s32.totalorder %s2293_s7, %s1944_s20 }
  0x34   : > { %p1941_p6 = pnand %p1939_p5, %p1925_p9  ;;  %p1947_p12 = scmp.lt.s32.totalorder %s1945_s25, %s1938_s26 }
  0x36   : > { %p1942_p8 = pneg %p1941_p6  ;;  %p1948_p13 = por %p1947_p12, %p1946_p10 }
  0x38   : > { %p1949_p0 = pnand %p1948_p13, %p1942_p8 }
  0x3a   : > { %1952 = shalt.err (!%p1949_p0)
}
  0x3b   : > { %s2140_s9 = smov 128   ;;  %s2141_s24 = smov 8  }
  0x3c   : > { %1768 = dma.hbm_to_vmem [thread:$0]  (!%p2297_p7), %s2291_s8, 512, %s2293_s7, %s2303_s1, %s2140_s9, %s2140_s9, %s2141_s24  }
  0x3d   : > { %s360_s28 = scalar_lea.vmem [#allocation8], %s2301_s23  ;;  %s2333_s26 = sadd.s32 4294967295, %s2137_s19  }
  0x3e   : > { %s367_s29 = sshll.u32 %s360_s28, 4  ;;  %s1589_s27 = sadd.s32 4294967294, %s2137_s19   ;;  %s2385_s29 = int_to_ptr.vmem [resolvable:$true] %s367_s29 }
  0x3f   : > { %s2776_s21 = smov (%p40_p4, %s2774_s21), 0  ;;  %p126_p11 = scmp.ne.s32.totalorder %s2113_s13, %s2109_s12 }
  0x40   : > { %2738 = sst [smem:[#allocation20_spill]] %s2776_s21  ;;  %p2713_p1 = scmp.eq.s32.totalorder %s2333_s26, 0 }
  0x41   : > { %s266_s20 = ssub.s32 %s2133_s18, %s2776_s21  ;;  %s269_s7 = sadd.s32 1, %s2105_s11 }
  0x42   : > { %p2349_p2 = por %p2713_p1, %p126_p11  ;;  %p267_p3 = scmp.eq.s32.totalorder %s266_s20, 0 }
  0x43   : > { %p279_p5 = scmp.ne.s32.totalorder %s2105_s11, %s2101_s10  ;;  %p280_p6 = scmp.eq.s32.totalorder %s2333_s26, 3 }
  0x44   : > { %s2739_s8 = scalar_select %p2349_p2, 1, 0 }
  0x45   : > { %s2357_s23 = scalar_select %p267_p3, %s2105_s11, %s269_s7  }
  0x46   : > { %p2359_p8 = por %p280_p6, %p279_p5  ;;  %p285_p4 = scmp.ne.s32.totalorder %s2101_s10, %s2097_s30 }
  0x47   : > { %2740 = sst [smem:[#allocation21_spill]] %s2357_s23  ;;  %p286_p10 = scmp.eq.s32.totalorder %s1589_s27, 3 }
  0x48   : > { %s2741_s25 = scalar_select %p2359_p8, 1, 0 }
  0x49   : > { %p1590_p12 = scmp.ge.s32.totalorder %s2137_s19, 1  ;;  %p293_p13 = scmp.lt.s32.totalorder %s2137_s19, 5 }
  0x4a   : > { %p2367_p0 = por %p286_p10, %p285_p4  ;;  %s2142_s24 = smov [#allocation3]  }
  0x4b   : > { %p2371_p11 = pnand %p1590_p12, %p293_p13  ;;  %s309_s28 = sshll.u32 %s2142_s24, 4  ;;  %s2375_s28 = int_to_ptr.vmem [resolvable:$true] %s309_s28 }
  0x4c   : > { %s2742_s12 = scalar_select %p2367_p0, 1, 0 }
  0x4d   : > { %s2743_s9 = scalar_select %p2371_p11, 1, 0 }
  0x4e   : > { %s1642_s20 = sshll.u32 %s2129_s17, 8  ;;  %p1761_p3 = pneg %p2371_p11 }
  0x4f   : > { %s2744_s5 = sld [smem:[#allocation26_spill]] }
  0x50   : > { %p2389_p5 = pnand %p1761_p3, %p2713_p1 }
  0x55   : > { %s2383_s3 = scalar_lea.hbm %s2744_s5, %s1642_s20  ;;  %s1958_s27 = scalar_lea.hbm %s2744_s5, 512 }
  0x56   : > { %s1953_s24 = scalar_lea.hbm %s2383_s3, 256  ;;  %p1959_p12 = scmp.lt.u32.totalorder %s2383_s3, %s2744_s5 }
  0x57   : > { %p1954_p6 = scmp.ne.s32.totalorder %s2383_s3, %s1953_s24  ;;  %p1960_p13 = scmp.lt.u32.totalorder %s1958_s27, %s1953_s24 }
  0x58   : > { %p1962_p3 = scmp.lt.u32.totalorder %s1953_s24, %s2383_s3 }
  0x59   : > { %p1956_p4 = pnand %p1954_p6, %p1925_p9  ;;  %p1961_p0 = por %p1960_p13, %p1959_p12 }
  0x5b   : > { %p1957_p10 = pneg %p1956_p4  ;;  %p1963_p1 = por %p1962_p3, %p1961_p0 }
  0x5d   : > { %p1964_p8 = pnand %p1963_p1, %p1957_p10 }
  0x5f   : > { %1967 = shalt.err (!%p1964_p8)
}
  0x60   : > { %s1968_s14 = scalar_lea.vmem %s2385_s29, 256  ;;  %s2143_s7 = smov [#allocation8]  }
  0x61   : > { %p1969_p6 = scmp.ne.s32.totalorder %s2385_s29, %s1968_s14  ;;  %s1973_s20 = sshll.u32 %s2143_s7, 4  ;;  %s1974_s20 = int_to_ptr.vmem [resolvable:$false] %s1973_s20 }
  0x62   : > { %s1975_s17 = scalar_lea.vmem %s1974_s20, 512  ;;  %p1976_p11 = scmp.lt.s32.totalorder %s2385_s29, %s1974_s20 }
  0x63   : > { %p1971_p4 = pnand %p1969_p6, %p1925_p9  ;;  %p1977_p12 = scmp.lt.s32.totalorder %s1975_s17, %s1968_s14 }
  0x65   : > { %p1972_p2 = pneg %p1971_p4  ;;  %p1978_p13 = por %p1977_p12, %p1976_p11 }
  0x67   : > { %p1979_p0 = pnand %p1978_p13, %p1972_p2 }
  0x69   : > { %1982 = shalt.err (!%p1979_p0)
}
  0x6a   : > { %s2144_s18 = smov 64   ;;  %s2145_s24 = smov 4  }
  0x6b   : > { %1771 = dma.hbm_to_vmem [thread:$0]  (!%p2297_p7), %s2383_s3, 256, %s2385_s29, %s2303_s1, %s2144_s18, %s2144_s18, %s2145_s24  }
  0x6c   : > { %s2746_s2 = sld [smem:[#allocation24_spill]]  ;;  %p1985_p1 = pneg %p2389_p5 }
  0x72   : > { %s1983_s7 = scalar_lea.hbm %s2746_s2, 16 }
  0x73   : > { %p1984_p9 = scmp.ne.s32.totalorder %s2746_s2, %s1983_s7  ;;  %p1990_p11 = scmp.lt.u32.totalorder %s1983_s7, %s2746_s2 }
  0x75   : > { %p1986_p2 = pnand %p1985_p1, %p1984_p9 }
  0x77   : > { %p1987_p8 = pneg %p1986_p2 }
  0x79   : > { %p1992_p10 = pnand %p1990_p11, %p1987_p8 }
  0x7b   : > { %1995 = shalt.err (!%p1992_p10)
}
  0x7c   : > { %s1996_s3 = scalar_lea.vmem %s2375_s28, 16  ;;  %s2003_s5 = scalar_lea.vmem %s2375_s28, 32 }
  0x7d   : > { %p1997_p7 = scmp.ne.s32.totalorder %s2375_s28, %s1996_s3  ;;  %p2004_p4 = scmp.lt.s32.totalorder %s2375_s28, %s2375_s28 }
  0x7e   : > { %p2005_p12 = scmp.lt.s32.totalorder %s2003_s5, %s1996_s3 }
  0x7f   : > { %p1999_p3 = pnand %p1997_p7, %p1985_p1 }
  0x80   : > { %p2006_p13 = por %p2005_p12, %p2004_p4 }
  0x81   : > { %p2000_p6 = pneg %p1999_p3 }
  0x83   : > { %p2007_p0 = pnand %p2006_p13, %p2000_p6 }
  0x85   : > { %2010 = shalt.err (!%p2007_p0)
}
  0x86   : > { %1764 = dma.hbm_to_vmem [thread:$0]  (!%p2389_p5), %s2746_s2, 16, %s2375_s28, [#allocation4]  }
  0x87   : > { %p2747_p9 = scmp.ne.s32.totalorder %s2743_s9, 0 }
  0x88   : > { %p2748_p1 = scmp.eq.s32.totalorder (!%p2747_p9), %s2333_s26, 0 }
  0x89   : > { %400 = sbr.rel (%p2747_p9) target bundleno = 2977 (0xba1), region = 56 }
  0x90   : > { %2084 = dma.done.wait (%p2748_p1), [#allocation4], 16   ;;  %p2749_p2 = pmov %p2748_p1 }
  0x91   : > { %s406_s1 = sand.u32 1, %s2333_s26   ;;  %s408_s29 = sand.u32 1, %s2113_s13  }
  0x92   : > { %2086 = vsyncadd (%p2749_p2), [#allocation4], 4294967280  ;;  %s1601_s21 = sshll.u32 %s408_s29, 5  ;;  %s407_s23 = scalar_lea.sflag [#allocation7], %s406_s1 }
  0x93   : > { %s2447_s17 = scalar_lea.vmem [#allocation6], %s1601_s21  ;;  %p2750_p8 = scmp.ne.s32.totalorder %s2739_s8, 0 }
  0x95   : > { %2088 = dma.done.wait (%p2750_p8), %s407_s23, 768  }
  0x96   : > { %2090 = vsyncadd (%p2750_p8), %s407_s23, 4294966528  ;;  %s2453_s9 = sshll.u32 %s408_s29, 4  ;;  %p479_p5 = scmp.lt.s32.totalorder %s2125_s16, 1 }
  0x97   : > { %p483_p11 = scmp.lt.s32.totalorder %s2121_s15, 1  ;;  %s2751_s0 = sld [smem:[#allocation22_spill]] }
  0x98   : > { %s480_s28 = scalar_select %p479_p5, %s2125_s16, 1 }
  0x99   : > { %s2460_s18 = scalar_select %p483_p11, %s2121_s15, 1 }
  0x9a   : > { %s1603_s8 = sshll.u32 %s480_s28, 3  ;;  %s2752_s2 = sld [smem:[#allocation27_spill]] }
  0x9b   : > { %s1643_s14 = sshll.u32 %s2460_s18, 6  ;;  %s490_s1 = scalar_lea.vmem %s2703_s6, %s2460_s18 }
  0x9c   : > { %s2469_s5 = scalar_lea.vmem %s2701_s4, %s1643_s14  ;;  %s1644_s29 = sshll.u32 %s2460_s18, 5 }
  0x9d   : > { %s482_s7 = scalar_lea.vmem %s2751_s0, %s1603_s8  ;;  %s1608_s21 = sshll.u32 %s2460_s18, 3 }
  0x9e   : > { %s2753_s8 = sld [smem:[#allocation28_spill]]  ;;  %s419_s0 = scalar_lea.vmem [#allocation8], %s2453_s9 }
  0x9f   : > { %s2754_s20 = sand.u32 1, %s2101_s10   ;;  %p1609_p10 = scmp.ne.s32.totalorder %s2121_s15, 0 }
  0xa0   : > { %s2480_s28 = scalar_lea.vmem %s2752_s2, %s1644_s29  ;;  %s2490_s14 = scalar_lea.vmem [#allocation9], %s2754_s20  ;;  %v2146_v1 = vmov (!%p1609_p10), 0.0   ;;  %vm2147_vm0 = vmmov (!%p1609_p10), 0   ;;  %v505_v4 = vld [vmem:[%s482_s7] sm:$0xff] (!%p1609_p10)  ;;  %vm538_vm1 = vcmask (!%p1609_p10), 392192   ;;  %vm582_vm2 = vcmask (!%p1609_p10), 261120  }
  0xa1   : > { %504 = sbr.rel (%p1609_p10) target bundleno = 394 (0x18a), region = 72  ;;  %s2755_s22 = sld [smem:[#allocation23_spill]] (!%p1609_p10)  ;;  %1673 = vmatprep.subr.bf16.mxu0 (!%p1609_p10), %v2146_v1  ;;  %1679 = vmatprep.mubr.msk.bf16.mxu0 (!%p1609_p10), %vm2147_vm0, %v2146_v1  ;;  %v506_v5 = vpack.c.bf16 (!%p1609_p10), %v505_v4, %v505_v4  ;;  %v1610_v6 = vld [vmem:[#allocation3] ss:$0 sm:$0xff] (!%p1609_p10) }
  0xa4   : > { %s2485_s27 = scalar_lea.vmem %s2753_s8, %s1608_s21 }
  0xa7   : > { %v1884_v0 = vld [vmem:[%s2755_s22] sm:$0xff] (!%p1609_p10)   ;;  %v1885_v2 = vld [vmem:[%s2755_s22 + $0x8] sm:$0xff] (!%p1609_p10)   ;;  %v1886_v3 = vld [vmem:[%s2755_s22 + $0x10] sm:$0xff] (!%p1609_p10)  }
  0xa8   : > { %1674 = vmatpush3.bf16.msra.mxu0 %v1884_v0 }
  0xa9   : > { %1675 = vmatprep.subr.bf16.mxu0 %v2146_v1 }
  0xac   : > { %1676 = vmatpush3.bf16.msra.mxu0 %v1885_v2 }
  0xad   : > { %1677 = vmatprep.subr.bf16.mxu0 %v2146_v1 }
  0xb0   : > { %1678 = vmatpush3.bf16.msra.mxu0 %v1886_v3 }
  0xb3   : > { %1680 = vmatmul.mubr.msk.bf16.vlgmr.msra.gmra.mrb[0].mxu0 %vm538_vm1, %v506_v5 }
 0x186   : > { %v576_v7 = vpop.f32.mrb[0].mxu0 }
 0x187   : > { %v577_v8 = vadd.f32 %v1610_v6, %v576_v7  ;;  %v1681_v9 = vpop.f32.mrb[1].mxu0 }
 0x188   : > { %v579_v10 = vpop.f32.mrb[2].mxu0 }
 0x189   : > { %583 = vst.msk [vmem:[#allocation2] sm:$0xff] %vm582_vm2, %v577_v8  ;;  %v1682_v11 = vpop.f32.mrb[3].mxu0 }
 0x18a PF: > { %v1887_v12 = vld [vmem:[%s2447_s17 + $0x4] ss:$8 sps:$4 sm:$0xff]   ;;  %v1889_v13 = vld [vmem:[%s2447_s17] ss:$8 sps:$4 sm:$0xff]   ;;  %v2148_v14 = vmov 0   ;;  %vm625_vm3 = vcmask 261120  }
 0x18b   : > { %661 = vmatprep.mubr.bf16.mxu0 %v2148_v14  ;;  %629 = vmatprep.subr.bf16.mxu0 %v1887_v12  ;;  %v1890_v15 = vld [vmem:[%s2447_s17 + $0x14] ss:$8 sps:$4 sm:$0xff]   ;;  %v1892_v16 = vld [vmem:[%s2447_s17 + $0x10] ss:$8 sps:$4 sm:$0xff]   ;;  %s2149_s17 = smov 104   ;;  %s2150_s7 = smov 120  }
 0x18c   : > { %630 = vmatpush1.bf16.msra.mxu0 %v1889_v13  ;;  %v589_v19 = vld [vmem:[%s2469_s5] sm:$0xff]  ;;  %s2151_s21 = smov 96   ;;  %s2152_s23 = smov 112   ;;  %v2153_v29 = vmov 0.0   ;;  %vm2154_vm4 = vmmov 0   ;;  %vm769_vm5 = vcmask 1043456  }
 0x18d   : > { %631 = vmatprep.subr.bf16.mxu0 %v1890_v15  ;;  %1689 = vmatprep.subr.bf16.mxu1 %v2153_v29  ;;  %vm765_vm6 = vcmask 64512   ;;  %s2155_s5 = smov 64   ;;  %s2156_s24 = smov 32   ;;  %vm1320_vm7 = vcmask 523264  }
 0x18e   : > { %1691 = vmatprep.mubr.msk.bf16.mxu1 %vm2154_vm4, %v2153_v29  ;;  %p1637_p7 = scmp.ne.s32.totalorder %s2121_s15, 1 }
 0x18f   : > { %vm1394_vm8 = vcmask (!%p1637_p7), 253952  }
 0x190   : > { %v2506_v17 = vld [vmem:[#allocation2] sm:$0xff]  ;;  %632 = vmatpush1.bf16.msra.mxu0 %v1892_v16 }
 0x191   : > { %v604_v18 = vpack.c.bf16 %v2506_v17, %v2506_v17  ;;  %1683 = vmatprep.subr.bf16.mxu0 %v2153_v29 }
 0x193   : > { %1619 = vmatmul.mubr.msk.bf16.vlgmr.msra.gmra.mrb[0].mxu0 %vm625_vm3, %v604_v18 }
 0x194   : > { %1685 = vmatprep.mubr.msk.bf16.mxu0 %vm2154_vm4, %v2153_v29 }
 0x266   : > { %v2512_v20 = vpop.f32.mrb[0].mxu0 }
 0x267   : > { %v670_v21 = vadd.f32 %v2512_v20, %v589_v19  ;;  %v2515_v22 = vpop.f32.mrb[1].mxu0  ;;  %v679_v63 = vpack.c.bf16 %v2512_v20, %v2512_v20 }
 0x268   : > { %v667_v23 = vpop.f32.mrb[2].mxu0  ;;  %v680_v62 = vpack.c.bf16 %v2515_v22, %v2515_v22 }
 0x269   : > { %v671_v24 = vpack.c.bf16 %v670_v21, %v670_v21  ;;  %v668_v25 = vpop.f32.mrb[3].mxu0 }
 0x26b   : > { %677 = vrot.lane.b32.xlu1 %v671_v24, %s2149_s17  ;;  %673 = vrot.lane.b32.xlu0 %v671_v24, %s2150_s7 }
 0x26f   : > { %689 = vrot.lane.b32.xlu1 %v671_v24, %s2151_s21  ;;  %675 = vrot.lane.b32.xlu0 %v671_v24, %s2152_s23 }
 0x2dd   : > { %v674_v26 = vpop.permute.xlu0 %673  ;;  %v678_v27 = vpop.permute.xlu1 %677 }
 0x2de   : > { %691 = vrot.lane.b32.xlu0 %v674_v26, %s2151_s21 }
 0x2e1   : > { %v676_v28 = vpop.permute.xlu0 %675  ;;  %v690_v30 = vpop.permute.xlu1 %689 }
 0x2e2   : > { %695 = vrot.lane.b32.xlu0 %v678_v27, %s2151_s21  ;;  %693 = vrot.lane.b32.xlu1 %v676_v28, %s2151_s21 }
 0x305   : > { %701 = vxpose.xlu1.c.b16.start.end [1/1] (short) (narrow) %v690_v30, 16 }
 0x350   : > { %v692_v31 = vpop.permute.xlu0 %691 }
 0x351   : > { %717 = vxpose.xlu0.c.b16.start.end [1/1] (short) (narrow) %v692_v31, 16 }
 0x354   : > { %v694_v32 = vpop.permute.xlu1 %693  ;;  %v696_v33 = vpop.permute.xlu0 %695 }
 0x355   : > { %733 = vxpose.xlu0.c.b16.start.end [1/1] (short) (narrow) %v694_v32, 16  ;;  %749 = vxpose.xlu1.c.b16.start.end [1/1] (short) (narrow) %v696_v33, 16 }
 0x36b   : > { %v709_v34 = vpop.trf.xlu1 }
 0x36c   : > { %v771_v35 = vsel %vm769_vm5, %v709_v34, 0 }
 0x36d   : > { %1684 = vmatpush3.bf16.msra.mxu0 %v771_v35 }
 0x36e   : > { %1695 = vmatprep.subr.bf16.mxu0 %v2153_v29 }
 0x370   : > { %1686 = vmatmul.mubr.msk.bf16.vlgmr.msra.gmra.mrb[4].mxu0 %vm765_vm6, %v671_v24 }
 0x371   : > { %1697 = vmatprep.mubr.msk.bf16.mxu0 %vm2154_vm4, %v2153_v29 }
 0x3b7   : > { %v725_v36 = vpop.trf.xlu0 }
 0x3b8   : > { %v817_v37 = vsel %vm769_vm5, %v725_v36, 0 }
 0x3b9   : > { %1690 = vmatpush3.bf16.msra.mxu1 %v817_v37 }
 0x3ba   : > { %1701 = vmatprep.subr.bf16.mxu1 %v2153_v29 }
 0x3bb   : > { %v741_v38 = vpop.trf.xlu0  ;;  %v757_v39 = vpop.trf.xlu1 }
 0x3bc   : > { %v863_v40 = vsel %vm769_vm5, %v741_v38, 0  ;;  %1692 = vmatmul.mubr.msk.bf16.vlgmr.msra.gmra.mrb[0].mxu1 %vm765_vm6, %v674_v26  ;;  %v909_v41 = vsel %vm769_vm5, %v757_v39, 0 }
 0x3bd   : > { %1696 = vmatpush3.bf16.msra.mxu0 %v863_v40  ;;  %1702 = vmatpush3.bf16.msra.mxu1 %v909_v41 }
 0x3be   : > { %1703 = vmatprep.mubr.msk.bf16.mxu1 %vm2154_vm4, %v2153_v29  ;;  %1707 = vmatprep.subr.bf16.mxu0 %v2153_v29 }
 0x3bf   : > { %1713 = vmatprep.subr.bf16.mxu1 %v2153_v29 }
 0x3c0   : > { %1698 = vmatmul.mubr.msk.bf16.vlgmr.msra.gmra.mrb[8].mxu0 %vm765_vm6, %v676_v28 }
 0x3c1   : > { %1709 = vmatprep.mubr.msk.bf16.mxu0 %vm2154_vm4, %v2153_v29 }
 0x3c4   : > { %1704 = vmatmul.mubr.msk.bf16.vlgmr.msra.gmra.mrb[4].mxu1 %vm765_vm6, %v678_v27 }
 0x3c5   : > { %1715 = vmatprep.mubr.msk.bf16.mxu1 %vm2154_vm4, %v2153_v29 }
 0x443   : > { %v807_v42 = vpop.f32.mrb[4].mxu0 }
 0x444   : > { %v1687_v43 = vpop.f32.mrb[5].mxu0  ;;  %v951_v44 = vsel %vm765_vm6, %v807_v42, -inf }
 0x445   : > { %952 = vmax.xlane.f32.xlu0 %v951_v44  ;;  %v810_v45 = vpop.f32.mrb[6].mxu0 }
 0x446   : > { %v1688_v46 = vpop.f32.mrb[7].mxu0 }
 0x48f   : > { %v853_v47 = vpop.f32.mrb[0].mxu1 }
 0x490   : > { %v1693_v48 = vpop.f32.mrb[1].mxu1  ;;  %v954_v49 = vsel %vm765_vm6, %v853_v47, -inf }
 0x491   : > { %955 = vmax.xlane.f32.xlu1 %v954_v49  ;;  %v856_v50 = vpop.f32.mrb[2].mxu1 }
 0x492   : > { %v1694_v51 = vpop.f32.mrb[3].mxu1 }
 0x493   : > { %v899_v52 = vpop.f32.mrb[8].mxu0 }
 0x494   : > { %v1699_v53 = vpop.f32.mrb[9].mxu0  ;;  %v957_v54 = vsel %vm765_vm6, %v899_v52, -inf }
 0x495   : > { %958 = vmax.xlane.f32.xlu0 %v957_v54  ;;  %v902_v55 = vpop.f32.mrb[10].mxu0  ;;  %v1198_v53 = vlaneseq }
 0x496   : > { %v1700_v56 = vpop.f32.mrb[11].mxu0 }
 0x497   : > { %v945_v57 = vpop.f32.mrb[4].mxu1  ;;  %v2585_v55 = vshrl.u32 %v1198_v53, 7 }
 0x498   : > { %v1705_v58 = vpop.f32.mrb[5].mxu1  ;;  %v960_v59 = vsel %vm765_vm6, %v945_v57, -inf }
 0x499   : > { %961 = vmax.xlane.f32.xlu1 %v960_v59  ;;  %v948_v60 = vpop.f32.mrb[6].mxu1 }
 0x49a   : > { %v1706_v61 = vpop.f32.mrb[7].mxu1 }
 0x4aa   : > { %685 = vrot.lane.b32.xlu1 %v680_v62, %s2155_s5 }
 0x4ab   : > { %682 = vrot.lane.b32.xlu0 %v679_v63, %s2151_s21 }
 0x4ae   : > { %687 = vrot.lane.b32.xlu1 %v680_v62, %s2156_s24 }
 0x4b2   : > { %999 = vrot.lane.b32.xlu1 %v679_v63, %s2155_s5 }
 0x4d2   : > { %v953_v0 = vpop.xlane.xlu0 %952 }
 0x4d3   : > { %v963_v1 = vsub.f32 %v807_v42, %v953_v0 }
 0x4d5   : > { %v967_v2 = vmul.f32 1.442695, %v963_v1  ;;  %v1200_v1 = vsub.s32 0, %v2585_v55 }
 0x4d7   : > { %1899 = vpow2.f32 %v967_v2 }
 0x4e1   : > { %v1900_v3 = vpop.eup %1899 }
 0x4e2   : > { %v975_v4 = vsel %vm765_vm6, %v1900_v3, 0.0 }
 0x4e3   : > { %976 = vadd.xlane.f32.xlu0 %v975_v4  ;;  %v2592_v4 = vld [vmem:[%s2485_s27] sm:$0x3f] }
 0x51e   : > { %v956_v5 = vpop.xlane.xlu1 %955 }
 0x51f   : > { %v964_v6 = vsub.f32 %v853_v47, %v956_v5 }
 0x521   : > { %v969_v7 = vmul.f32 1.442695, %v964_v6 }
 0x522   : > { %v959_v8 = vpop.xlane.xlu0 %958 }
 0x523   : > { %1901 = vpow2.f32 %v969_v7  ;;  %v965_v9 = vsub.f32 %v899_v52, %v959_v8  ;;  %v1201_v7 = vrot.slane %v2592_v4, %v1200_v1  ;;  %v1380_v1 = vsub.s32 4, %v2585_v55 }
 0x525   : > { %v971_v10 = vmul.f32 1.442695, %v965_v9 }
 0x526   : > { %v962_v11 = vpop.xlane.xlu1 %961  ;;  %v683_v25 = vpop.permute.xlu0 %682 }
 0x527   : > { %1903 = vpow2.f32 %v971_v10  ;;  %v966_v12 = vsub.f32 %v945_v57, %v962_v11 }
 0x529   : > { %v973_v13 = vmul.f32 1.442695, %v966_v12 }
 0x52a   : > { %v686_v14 = vpop.permute.xlu1 %685 }
 0x52b   : > { %1905 = vpow2.f32 %v973_v13 }
 0x52d   : > { %v1902_v15 = vpop.eup %1901 }
 0x52e   : > { %v688_v16 = vpop.permute.xlu1 %687  ;;  %v978_v18 = vsel %vm765_vm6, %v1902_v15, 0.0 }
 0x52f   : > { %979 = vadd.xlane.f32.xlu1 %v978_v18 }
 0x531   : > { %v1904_v19 = vpop.eup %1903 }
 0x532   : > { %v1000_v20 = vpop.permute.xlu1 %999  ;;  %v981_v21 = vsel %vm765_vm6, %v1904_v19, 0.0 }
 0x533   : > { %v1005_v22 = vsel %vm769_vm5, %v1000_v20, 0  ;;  %982 = vadd.xlane.f32.xlu0 %v981_v21 }
 0x534   : > { %1708 = vmatpush3.bf16.msra.mxu0 %v1005_v22  ;;  %v1893_v22 = vld [vmem:[%s419_s0] sm:$0xff]  }
 0x535   : > { %v1906_v23 = vpop.eup %1905  ;;  %1719 = vmatprep.subr.bf16.mxu0 %v2153_v29 }
 0x536   : > { %v984_v24 = vsel %vm765_vm6, %v1906_v23, 0.0 }
 0x537   : > { %985 = vadd.xlane.f32.xlu0 %v984_v24  ;;  %v1896_v24 = vld [vmem:[%s2480_s28 + $0x8] sm:$0xff]  }
 0x540   : > { %1095 = vrot.lane.b32.xlu1 %v686_v14, %s2155_s5 }
 0x544   : > { %1143 = vrot.lane.b32.xlu1 %v688_v16, %s2155_s5 }
 0x54d   : > { %1047 = vrot.lane.b32.xlu0 %v683_v25, %s2155_s5 }
 0x570   : > { %v977_v26 = vpop.xlane.xlu0 %976 }
 0x571   : > { %1907 = vrcp.f32 %v977_v26 }
 0x57b   : > { %v1908_v27 = vpop.eup %1907 }
 0x57c   : > { %v991_v28 = vmul.f32 %v1908_v27, %v1900_v3 }
 0x57e   : > { %v995_v30 = vpack.c.bf16 %v991_v28, %v991_v28  ;;  %v1220_v28 = vsub.s32 2, %v2585_v55 }
 0x580   : > { %1710 = vmatmul.mubr.msk.bf16.vlgmr.msra.gmra.mrb[12].mxu0 %vm765_vm6, %v995_v30  ;;  %v1225_v30 = vsub.s32 3, %v2585_v55 }
 0x581   : > { %1721 = vmatprep.mubr.msk.bf16.mxu0 %vm2154_vm4, %v2153_v29 }
 0x5bc   : > { %v980_v31 = vpop.xlane.xlu1 %979 }
 0x5bd   : > { %1909 = vrcp.f32 %v980_v31  ;;  %v1221_v31 = vrot.slane %v2592_v4, %v1220_v28 }
 0x5c0   : > { %v1096_v32 = vpop.permute.xlu1 %1095  ;;  %v983_v33 = vpop.xlane.xlu0 %982 }
 0x5c1   : > { %v1101_v34 = vsel %vm769_vm5, %v1096_v32, 0  ;;  %1911 = vrcp.f32 %v983_v33 }
 0x5c2   : > { %1720 = vmatpush3.bf16.msra.mxu0 %v1101_v34  ;;  %v1226_v34 = vrot.slane %v2592_v4, %v1225_v30 }
 0x5c3   : > { %1731 = vmatprep.subr.bf16.mxu0 %v2153_v29 }
 0x5c4   : > { %v986_v35 = vpop.xlane.xlu0 %985  ;;  %v1144_v40 = vpop.permute.xlu1 %1143 }
 0x5c5   : > { %1913 = vrcp.f32 %v986_v35  ;;  %v1149_v44 = vsel %vm769_vm5, %v1144_v40, 0  ;;  %v1628_v40 = vld [vmem:[%s490_s1] ss:$0 sm:$0xff] }
 0x5c7   : > { %v1910_v36 = vpop.eup %1909 }
 0x5c8   : > { %v992_v37 = vmul.f32 %v1910_v36, %v1902_v15  ;;  %v1048_v38 = vpop.permute.xlu0 %1047 }
 0x5c9   : > { %v1053_v39 = vsel %vm769_vm5, %v1048_v38, 0  ;;  %v1897_v38 = vld [vmem:[%s2480_s28 + $0x10] sm:$0xff]  }
 0x5ca   : > { %1714 = vmatpush3.bf16.msra.mxu1 %v1053_v39  ;;  %v996_v41 = vpack.c.bf16 %v992_v37, %v992_v37  ;;  %v1898_v39 = vld [vmem:[%s2480_s28 + $0x18] sm:$0xff]  }
 0x5cb   : > { %v1912_v42 = vpop.eup %1911  ;;  %1725 = vmatprep.subr.bf16.mxu1 %v2153_v29 }
 0x5cc   : > { %v993_v43 = vmul.f32 %v1912_v42, %v1904_v19 }
 0x5cd   : > { %1716 = vmatmul.mubr.msk.bf16.vlgmr.msra.gmra.mrb[8].mxu1 %vm765_vm6, %v996_v41 }
 0x5ce   : > { %1726 = vmatpush3.bf16.msra.mxu1 %v1149_v44  ;;  %v997_v45 = vpack.c.bf16 %v993_v43, %v993_v43  ;;  %1727 = vmatprep.mubr.msk.bf16.mxu1 %vm2154_vm4, %v2153_v29 }
 0x5cf   : > { %v1914_v46 = vpop.eup %1913  ;;  %1739 = vmatprep.subr.bf16.mxu1 %v2153_v29 }
 0x5d0   : > { %v994_v47 = vmul.f32 %v1914_v46, %v1906_v23  ;;  %1722 = vmatmul.mubr.msk.bf16.vlgmr.msra.gmra.mrb[16].mxu0 %vm765_vm6, %v997_v45  ;;  %v1894_v23 = vld [vmem:[%s419_s0 + $0x8] sm:$0xff]  }
 0x5d1   : > { %1735 = vmatprep.mubr.msk.bf16.mxu0 %vm2154_vm4, %v2153_v29  ;;  %1732 = vmatpush3.bf16.msra.mxu0 %v1893_v22 }
 0x5d2   : > { %v998_v48 = vpack.c.bf16 %v994_v47, %v994_v47  ;;  %1733 = vmatprep.subr.bf16.mxu0 %v2153_v29 }
 0x5d5   : > { %1728 = vmatmul.mubr.msk.bf16.vlgmr.msra.gmra.mrb[12].mxu1 %vm765_vm6, %v998_v48  ;;  %1734 = vmatpush3.bf16.msra.mxu0 %v1894_v23  ;;  %v1294_v48 = vsub.s32 1, %v2585_v55 }
 0x5d6   : > { %1747 = vmatprep.mubr.msk.bf16.mxu1 %vm2154_vm4, %v2153_v29 }
 0x653   : > { %v1041_v49 = vpop.f32.mrb[12].mxu0 }
 0x654   : > { %v1711_v50 = vpop.f32.mrb[13].mxu0  ;;  %v1191_v56 = vsel %vm625_vm3, %v1041_v49, 0.0 }
 0x655   : > { %v1044_v51 = vpop.f32.mrb[14].mxu0 }
 0x656   : > { %v1712_v52 = vpop.f32.mrb[15].mxu0 }
 0x6a0   : > { %v1089_v54 = vpop.f32.mrb[8].mxu1 }
 0x6a1   : > { %v1192_v57 = vsel %vm625_vm3, %v1089_v54, 0.0  ;;  %v1717_v58 = vpop.f32.mrb[9].mxu1 }
 0x6a2   : > { %v1193_v59 = vadd.f32 %v1192_v57, %v1191_v56  ;;  %v1092_v60 = vpop.f32.mrb[10].mxu1 }
 0x6a3   : > { %v1718_v61 = vpop.f32.mrb[11].mxu1  ;;  %v1137_v62 = vpop.f32.mrb[16].mxu0 }
 0x6a4   : > { %v1194_v63 = vsel %vm625_vm3, %v1137_v62, 0.0  ;;  %v1723_v0 = vpop.f32.mrb[17].mxu0 }
 0x6a5   : > { %v1195_v2 = vadd.f32 %v1194_v63, %v1193_v59  ;;  %v1140_v3 = vpop.f32.mrb[18].mxu0 }
 0x6a6   : > { %v1724_v5 = vpop.f32.mrb[19].mxu0  ;;  %v1381_v3 = vrot.slane %v2592_v4, %v1380_v1 }
 0x6a8   : > { %v1185_v6 = vpop.f32.mrb[12].mxu1 }
 0x6a9   : > { %v1196_v8 = vsel %vm625_vm3, %v1185_v6, 0.0  ;;  %v1729_v9 = vpop.f32.mrb[13].mxu1 }
 0x6aa   : > { %v1197_v10 = vadd.f32 %v1196_v8, %v1195_v2  ;;  %v1188_v11 = vpop.f32.mrb[14].mxu1  ;;  %v1385_v2 = vsub.s32 5, %v2585_v55 }
 0x6ab   : > { %v1730_v12 = vpop.f32.mrb[15].mxu1 }
 0x6ac   : > { %v1202_v13 = vadd.f32 %v1201_v7, %v1197_v10  ;;  %v1386_v6 = vrot.slane %v2592_v4, %v1385_v2 }
 0x6ae   : > { %v1203_v14 = vadd.f32 %v1202_v13, %v2506_v17  ;;  %v1895_v17 = vld [vmem:[%s2480_s28] sm:$0xff]  }
 0x6af   : > { %1740 = vmatpush3.bf16.msra.mxu1 %v1895_v17 }
 0x6b0   : > { %v1204_v15 = vsel %vm625_vm3, %v1203_v14, 0.0  ;;  %1741 = vmatprep.subr.bf16.mxu1 %v2153_v29 }
 0x6b1   : > { %1205 = vadd.xlane.f32.xlu0 %v1204_v15 }
 0x6b3   : > { %1742 = vmatpush3.bf16.msra.mxu1 %v1896_v24 }
 0x6b4   : > { %1743 = vmatprep.subr.bf16.mxu1 %v2153_v29 }
 0x6b7   : > { %1744 = vmatpush3.bf16.msra.mxu1 %v1897_v38 }
 0x6b8   : > { %1745 = vmatprep.subr.bf16.mxu1 %v2153_v29  ;;  %v1295_v29 = vrot.slane %v2592_v4, %v1294_v48 }
 0x6bb   : > { %1746 = vmatpush3.bf16.msra.mxu1 %v1898_v39 }
 0x73e   : > { %v1206_v16 = vpop.xlane.xlu0 %1205 }
 0x73f   : > { %v1208_v18 = vmul.f32 0.03125, %v1206_v16 }
 0x741   : > { %v1209_v19 = vsub.f32 %v1203_v14, %v1208_v18 }
 0x743   : > { %v1210_v20 = vmul.f32 %v1209_v19, %v1209_v19 }
 0x745   : > { %v1211_v21 = vsel %vm625_vm3, %v1210_v20, 0.0 }
 0x746   : > { %1212 = vadd.xlane.f32.xlu1 %v1211_v21 }
 0x7d3   : > { %v1213_v25 = vpop.xlane.xlu1 %1212 }
 0x7d4   : > { %v1214_v26 = vmul.f32 0.03125, %v1213_v25 }
 0x7d6   : > { %v1215_v27 = vadd.f32 1e-05, %v1214_v26 }
 0x7d8   : > { %1915 = vrsqrt.f32 %v1215_v27 }
 0x7e2   : > { %v1916_v32 = vpop.eup %1915 }
 0x7e3   : > { %v1217_v33 = vmul.f32 %v1916_v32, %v1209_v19 }
 0x7e5   : > { %v1222_v35 = vmul.f32 %v1221_v31, %v1217_v33 }
 0x7e7   : > { %v1227_v36 = vadd.f32 %v1226_v34, %v1222_v35 }
 0x7e9   : > { %v1228_v37 = vpack.c.bf16 %v1227_v36, %v1227_v36 }
 0x7eb   : > { %1736 = vmatmul.mubr.msk.bf16.vlgmr.msra.gmra.mrb[20].mxu0 %vm625_vm3, %v1228_v37 }
 0x8be   : > { %v1284_v41 = vpop.f32.mrb[20].mxu0 }
 0x8bf   : > { %v1285_v42 = vadd.f32 %v1628_v40, %v1284_v41  ;;  %v1737_v43 = vpop.f32.mrb[21].mxu0 }
 0x8c0   : > { %v1287_v44 = vpop.f32.mrb[22].mxu0 }
 0x8c1   : > { %v1290_v45 = vmax.f32 %v1285_v42, 0.0  ;;  %v1738_v46 = vpop.f32.mrb[23].mxu0 }
 0x8c3   : > { %v1291_v47 = vpack.c.bf16 %v1290_v45, %v1290_v45 }
 0x8c5   : > { %1748 = vmatmul.mubr.msk.bf16.vlgmr.msra.gmra.mrb[16].mxu1 %vm1320_vm7, %v1291_v47 }
 0x998   : > { %v1358_v49 = vpop.f32.mrb[16].mxu1 }
 0x999   : > { %v1359_v50 = vadd.f32 %v1358_v49, %v1295_v29  ;;  %v1749_v51 = vpop.f32.mrb[17].mxu1 }
 0x99a   : > { %v1361_v52 = vpop.f32.mrb[18].mxu1 }
 0x99b   : > { %v1750_v53 = vpop.f32.mrb[19].mxu1  ;;  %v1364_v54 = vadd.f32 %v1359_v50, %v1227_v36 }
 0x99d   : > { %v1365_v56 = vsel %vm625_vm3, %v1364_v54, 0.0 }
 0x99e   : > { %1366 = vadd.xlane.f32.xlu0 %v1365_v56 }
 0xa2b   : > { %v1367_v57 = vpop.xlane.xlu0 %1366 }
 0xa2c   : > { %v1368_v58 = vmul.f32 0.03125, %v1367_v57 }
 0xa2e   : > { %v1369_v59 = vsub.f32 %v1364_v54, %v1368_v58 }
 0xa30   : > { %v1370_v60 = vmul.f32 %v1369_v59, %v1369_v59 }
 0xa32   : > { %v1371_v61 = vsel %vm625_vm3, %v1370_v60, 0.0 }
 0xa33   : > { %1372 = vadd.xlane.f32.xlu0 %v1371_v61 }
 0xac0   : > { %v1373_v62 = vpop.xlane.xlu0 %1372 }
 0xac1   : > { %v1374_v63 = vmul.f32 0.03125, %v1373_v62 }
 0xac3   : > { %v1375_v0 = vadd.f32 1e-05, %v1374_v63 }
 0xac5   : > { %1917 = vrsqrt.f32 %v1375_v0 }
 0xacf   : > { %v1918_v5 = vpop.eup %1917 }
 0xad0   : > { %v1377_v7 = vmul.f32 %v1918_v5, %v1369_v59  ;;  %1392 = sbr.rel (%p1637_p7) target bundleno = 2950 (0xb86), region = 76 }
 0xad2   : > { %v1382_v8 = vmul.f32 %v1381_v3, %v1377_v7 }
 0xad4   : > { %v1387_v9 = vadd.f32 %v1386_v6, %v1382_v8 }
 0xad6   : > { %1388 = vst.msk [vmem:[#allocation2] sm:$0xff] %vm625_vm3, %v1387_v9  ;;  %v1393_v10 = vmul.f32 (!%p1637_p7), %v1387_v9, %v1387_v9 }
 0xad8   : > { %v1395_v11 = vsel %vm1394_vm8, %v1393_v10, 0.0 }
 0xad9   : > { %1396 = vadd.xlane.f32.xlu0 %v1395_v11 }
 0xb66   : > { %v1397_v55 = vpop.xlane.xlu0 %1396 }
 0xb67   : > { %1919 = vrsqrt.f32 %v1397_v55  ;;  %vm1400_vm9 = vcmp.eq.f32.partialorder %v1397_v55, inf  ;;  %v1403_v4 = vand.u32 2147483648, %v1397_v55  ;;  %vm1402_vm10 = vcmp.eq.f32.partialorder %v1397_v55, 0.0 }
 0xb71   : > { %v1920_v12 = vpop.eup %1919 }
 0xb72   : > { %v1399_v13 = vmul.f32 %v1920_v12, %v1397_v55 }
 0xb74   : > { %v1401_v14 = vsel %vm1400_vm9, %v1397_v55, %v1399_v13 }
 0xb75   : > { %v1404_v15 = vsel %vm1402_vm10, %v1403_v4, %v1401_v14 }
 0xb76   : > { %v1405_v16 = vmax.f32 %v1404_v15, 1e-12 }
 0xb78   : > { %1921 = vrcp.f32 %v1405_v16 }
 0xb82   : > { %v1922_v18 = vpop.eup %1921 }
 0xb83   : > { %v1407_v19 = vmul.f32 %v1922_v18, %v1387_v9 }
 0xb85   : > { %1408 = vst.msk [vmem:[%s2490_s14] sm:$0x1] %vm1394_vm8, %v1407_v19 }
 0xb86 PF: > { %s1638_s15 = sshll.u32 %s2125_s16, 4  ;;  %s2756_s28 = sld [smem:[#allocation29_spill]] }
 0xb87   : > { %s1422_s27 = sshll.u32 %s2490_s14, 4  ;;  %s2757_s20 = sand.u32 1, %s2101_s10   ;;  %s1423_s27 = int_to_ptr.vmem [resolvable:$true] %s1422_s27 }
 0xb88   : > { %s1410_s3 = scalar_lea.sflag [#allocation5], %s2757_s20  ;;  %s2011_s11 = scalar_lea.vmem %s1423_s27, 16 }
 0xb89   : > { %p2012_p3 = scmp.ne.s32.totalorder %s1423_s27, %s2011_s11  ;;  %p2758_p6 = scmp.ne.s32.totalorder %s2741_s25, 0 }
 0xb8a   : > { %s2157_s2 = smov [#allocation9]  }
 0xb8b   : > { %p2013_p4 = pnand %p2012_p3, %p2758_p6  ;;  %s2015_s26 = sshll.u32 %s2157_s2, 4  ;;  %s2016_s26 = int_to_ptr.vmem [resolvable:$false] %s2015_s26 }
 0xb8c   : > { %s2638_s8 = scalar_lea.hbm %s2756_s28, %s1638_s15  ;;  %s2017_s13 = scalar_lea.vmem %s2016_s26, 32 }
 0xb8d   : > { %p2014_p12 = pneg %p2013_p4  ;;  %p2018_p13 = scmp.lt.s32.totalorder %s1423_s27, %s2016_s26 }
 0xb8e   : > { %p2019_p0 = scmp.lt.s32.totalorder %s2017_s13, %s2011_s11 }
 0xb90   : > { %p2020_p9 = por %p2019_p0, %p2018_p13 }
 0xb92   : > { %p2021_p1 = pnand %p2020_p9, %p2014_p12 }
 0xb94   : > { %2024 = shalt.err (!%p2021_p1)
}
 0xb95   : > { %s2025_s16 = scalar_lea.hbm %s2638_s8, 16  ;;  %s2029_s17 = scalar_lea.hbm %s2756_s28, 32 }
 0xb96   : > { %p2026_p2 = scmp.ne.s32.totalorder %s2638_s8, %s2025_s16  ;;  %p2030_p11 = scmp.lt.u32.totalorder %s2638_s8, %s2756_s28 }
 0xb97   : > { %p2031_p10 = scmp.lt.u32.totalorder %s2029_s17, %s2025_s16  ;;  %p2033_p3 = scmp.lt.u32.totalorder %s2025_s16, %s2638_s8 }
 0xb98   : > { %p2027_p8 = pnand %p2026_p2, %p2758_p6 }
 0xb99   : > { %p2032_p7 = por %p2031_p10, %p2030_p11 }
 0xb9a   : > { %p2028_p5 = pneg %p2027_p8 }
 0xb9b   : > { %p2034_p4 = por %p2033_p3, %p2032_p7 }
 0xb9d   : > { %p2035_p12 = pnand %p2034_p4, %p2028_p5 }
 0xb9f   : > { %2038 = shalt.err (!%p2035_p12)
}
 0xba0   : > { %1759 = dma.vmem_to_hbm [thread:$0]  (%p2758_p6), %s1423_s27, 16, %s2638_s8, %s1410_s3  }
 0xba1 PF: > { %p1779_p13 = scmp.ge.s32.totalorder %s2137_s19, 2  ;;  %s1434_s23 = sand.u32 1, %s2097_s30  }
 0xba2   : > { %p2759_p0 = scmp.ne.s32.totalorder %s2742_s12, 0  ;;  %s1435_s5 = scalar_lea.sflag [#allocation5], %s1434_s23 }
 0xba4   : > { %p1773_p9 = pnand %p1779_p13, %p2759_p0 }
 0xba6   : > { %2092 = dma.done.wait (!%p1773_p9), %s1435_s5, 16  }
 0xba7   : > { %2094 = vsyncadd (!%p1773_p9), %s1435_s5, 4294967280  ;;  %s26_s19 = sadd.s32 1, %s2137_s19   ;;  %s2760_s24 = sld [smem:[#allocation13_spill]] }
 0xba8   : > { %p23_p1 = scmp.ge.s32.totalorder %s26_s19, 6   ;;  %s2761_s11 = sld [smem:[#allocation21_spill]] }
 0xba9   : > { %s2762_s12 = sld [smem:[#allocation14_spill]]  ;;  %s2763_s13 = sld [smem:[#allocation15_spill]] }
 0xbaa   : > { %s2764_s14 = sld [smem:[#allocation19_spill]]  ;;  %s2765_s15 = sld [smem:[#allocation16_spill]] }
 0xbab   : > { %s2766_s16 = sld [smem:[#allocation17_spill]]  ;;  %s2767_s17 = sld [smem:[#allocation18_spill]] }
 0xbac   : > { %s2768_s18 = sld [smem:[#allocation20_spill]]  ;;  %s2769_s30 = smov %s2101_s10 }
 0xbad   : > { %s2770_s10 = smov %s2760_s24  ;;  %25 = sbr.rel (!%p23_p1) target bundleno = 19 (0x13), region = 140 }
 0xbb4   :  { %1439 = vsyncpa [#allocation4], 1 }
 0xbb5   :  { %1441 = vsyncpa [#allocation4 + $0x1], 1 }
 0xbb6   :  { %1442 = vsyncpa [#allocation7], 1 }
 0xbb7   :  { %1444 = vsyncpa [#allocation7 + $0x1], 1 }
 0xbb8   :  { %1445 = vsyncpa [#allocation5], 1 }
 0xbb9   :  { %1447 = vsyncpa [#allocation5 + $0x1], 1 }

</bundles_post_ra>
